<compile_context>
chip_gen: v7x
topology: tpu7x:2x2x1
jax: 0.10.0
libtpu: 0.0.40
codegen_flags: <defaults>
</compile_context>

<pallas_src>
import functools

import jax
import jax.numpy as jnp
from jax.experimental import pallas as pl
from jax.experimental.pallas import tpu as pltpu


# ----------------------------------------------------------------------------
# Pallas kernel (one body, trace-time specialized by flags)
# ----------------------------------------------------------------------------
def _compiler_params():
    # Working set per step is a few MB; 32 MiB scoped VMEM is safe on
    # v5e/v6e/v7x.  Leading grid axis is megacore-parallel, reduction last.
    return pltpu.CompilerParams(
        dimension_semantics=("parallel", "arbitrary"),
        vmem_limit_bytes=32 * 1024 * 1024,
    )


def _mlp_layer_kernel(*refs, apply_affine, is_last, m_real, m_pad, m_tile):
    """One 1x1-conv (channel matmul) layer over a lane tile.

    Inner layer  : outputs (y bf16, sum, ssq)           grid = (P, n_blk // P)
    Last  layer  : outputs (ymax, ymin, sum, ssq)       grid = (n_m, K)
    apply_affine : fold previous layer's BN (scale, shift) + ReLU into the input.
    """
    if apply_affine:
        x_ref, w_ref, scale_ref, shift_ref = refs[:4]
        out_refs = refs[4:]
    else:
        x_ref, w_ref = refs[:2]
        out_refs = refs[2:]
    if is_last:
        ymax_ref, ymin_ref, sum_ref, ssq_ref = out_refs
    else:
        y_ref, sum_ref, ssq_ref = out_refs

    inner = pl.program_id(1)  # inner ("arbitrary") axis: lane tiles / K slabs

    # ---- previous layer's folded BN affine + ReLU (conv bias omitted: it is
    # ---- exactly cancelled by train-mode BN mean subtraction) --------------
    if apply_affine:
        h = jnp.maximum(
            x_ref[...].astype(jnp.float32) * scale_ref[...] + shift_ref[...], 0.0)
        if m_pad > m_real:
            # Zero the pad columns so they contribute exactly 0 to this
            # layer's matmul output and hence to the BN statistics.
            n_m_per_slab = m_pad // m_tile
            if is_last:
                m_blk = pl.program_id(0)
            else:
                gb = pl.program_id(0) * pl.num_programs(1) + inner
                m_blk = gb % n_m_per_slab
            col = jax.lax.broadcasted_iota(jnp.int32, h.shape, 1) + m_blk * m_tile
            h = jnp.where(col < m_real, h, 0.0)
        h = h.astype(jnp.bfloat16)
    else:
        # Layer 0: raw grouped features (already bf16, pad columns already 0).
        h = x_ref[...]

    # ---- 1x1 Conv2d == channel matmul; bf16 operands, f32 accumulate -------
    y = jnp.dot(w_ref[...], h, preferred_element_type=jnp.float32)  # (C_out, mt)

    # ---- single-pass BN statistics (resident accumulator over inner axis) --
    @pl.when(inner == 0)
    def _():
        sum_ref[...] = jnp.zeros_like(sum_ref)
        ssq_ref[...] = jnp.zeros_like(ssq_ref)

    sum_ref[0] = sum_ref[0] + jnp.sum(y, axis=1, keepdims=True)
    ssq_ref[0] = ssq_ref[0] + jnp.sum(y * y, axis=1, keepdims=True)

    if is_last:
        # Fused reduction over K (inner axis): keep running max AND min of the
        # pre-BN activation; the wrapper picks max vs min per channel by
        # sign(folded scale), which commutes with the monotone affine + ReLU.
        @pl.when(inner == 0)
        def _():
            ymax_ref[...] = y
            ymin_ref[...] = y

        @pl.when(inner > 0)
        def _():
            ymax_ref[...] = jnp.maximum(ymax_ref[...], y)
            ymin_ref[...] = jnp.minimum(ymin_ref[...], y)
    else:
        # Pre-BN activation back to HBM in bf16 (next layer's input).
        y_ref[...] = y.astype(y_ref.dtype)


# ----------------------------------------------------------------------------
# pallas_call wrappers
# ----------------------------------------------------------------------------
def _pick_m_tile(m_pad):
    # m_pad is always a multiple of 128; prefer big lane tiles (85%+ roofline).
    for t in (2048, 1024, 512, 256, 128):
        if m_pad % t == 0:
            return t
    raise ValueError("lane axis must be padded to a multiple of 128")


def _run_mlp_inner_layer(x, w_bf16, scale, shift, *, m_tile, m_real, m_pad):
    """x: (C_in, K*M_pad) bf16 -> (y (C_out, K*M_pad) bf16, sum/ssq (P,C_out,1))."""
    c_in, L = x.shape
    c_out = w_bf16.shape[0]
    n_blk = L // m_tile
    # 2-way leading parallel axis keeps both v7x TensorCores busy (harmless on
    # single-TC v5e/v6e); each half owns its own partial-stats slice.
    P = 2 if (n_blk % 2 == 0 and n_blk >= 2) else 1
    n_inner = n_blk // P

    def lane_map(p, m):
        return (0, p * n_inner + m)

    in_specs = [
        pl.BlockSpec((c_in, m_tile), lane_map),
        pl.BlockSpec((c_out, c_in), lambda p, m: (0, 0)),
    ]
    args = [x, w_bf16]
    if scale is not None:
        in_specs += [pl.BlockSpec((c_in, 1), lambda p, m: (0, 0)),
                     pl.BlockSpec((c_in, 1), lambda p, m: (0, 0))]
        args += [scale, shift]

    out_specs = (
        pl.BlockSpec((c_out, m_tile), lane_map),
        pl.BlockSpec((1, c_out, 1), lambda p, m: (p, 0, 0)),
        pl.BlockSpec((1, c_out, 1), lambda p, m: (p, 0, 0)),
    )
    out_shape = (
        jax.ShapeDtypeStruct((c_out, L), jnp.bfloat16),
        jax.ShapeDtypeStruct((P, c_out, 1), jnp.float32),
        jax.ShapeDtypeStruct((P, c_out, 1), jnp.float32),
    )
    kernel = functools.partial(
        _mlp_layer_kernel, apply_affine=scale is not None, is_last=False,
        m_real=m_real, m_pad=m_pad, m_tile=m_tile)
    return pl.pallas_call(
        kernel,
        grid=(P, n_inner),
        in_specs=in_specs,
        out_specs=out_specs,
        out_shape=out_shape,
        compiler_params=_compiler_params(),
    )(*args)


def _run_mlp_last_layer(x, w_bf16, scale, shift, *, m_tile, m_real, m_pad, nsample):
    """Last layer: matmul + fused max/min over K.  Returns (ymax, ymin, sum, ssq)."""
    c_in, L = x.shape
    c_out = w_bf16.shape[0]
    n_m = m_pad // m_tile

    def x_map(m, k):
        return (0, k * n_m + m)

    in_specs = [
        pl.BlockSpec((c_in, m_tile), x_map),
        pl.BlockSpec((c_out, c_in), lambda m, k: (0, 0)),
    ]
    args = [x, w_bf16]
    if scale is not None:
        in_specs += [pl.BlockSpec((c_in, 1), lambda m, k: (0, 0)),
                     pl.BlockSpec((c_in, 1), lambda m, k: (0, 0))]
        args += [scale, shift]

    out_specs = (
        pl.BlockSpec((c_out, m_tile), lambda m, k: (0, m)),   # running max (resident over K)
        pl.BlockSpec((c_out, m_tile), lambda m, k: (0, m)),   # running min (resident over K)
        pl.BlockSpec((1, c_out, 1), lambda m, k: (m, 0, 0)),  # per-tile partial sum
        pl.BlockSpec((1, c_out, 1), lambda m, k: (m, 0, 0)),  # per-tile partial ssq
    )
    out_shape = (
        jax.ShapeDtypeStruct((c_out, m_pad), jnp.float32),
        jax.ShapeDtypeStruct((c_out, m_pad), jnp.float32),
        jax.ShapeDtypeStruct((n_m, c_out, 1), jnp.float32),
        jax.ShapeDtypeStruct((n_m, c_out, 1), jnp.float32),
    )
    kernel = functools.partial(
        _mlp_layer_kernel, apply_affine=scale is not None, is_last=True,
        m_real=m_real, m_pad=m_pad, m_tile=m_tile)
    return pl.pallas_call(
        kernel,
        grid=(n_m, nsample),   # lane tiles parallel, K is the (last) reduction axis
        in_specs=in_specs,
        out_specs=out_specs,
        out_shape=out_shape,
        compiler_params=_compiler_params(),
    )(*args)


def run_scale_mlp(x_ckm, layer_params, m_real, m_pad, nsample, eps=1e-5):
    """x_ckm: (C_in0, K*M_pad) bf16 -> (C_out_last, B*S) f32 after conv/BN/ReLU stack + max over K."""
    R = float(nsample * m_real)     # BN reduces over (B, K, S) == all real columns
    m_tile = _pick_m_tile(m_pad)

    h = x_ckm
    scale = None
    shift = None
    n_layers = len(layer_params)
    for j, (w, _bias, gamma, beta) in enumerate(layer_params):
        # _bias never reaches the kernel: train-mode BN cancels it exactly.
        is_last = (j == n_layers - 1)
        w_bf16 = w.astype(jnp.bfloat16)
        if is_last:
            ymax, ymin, ssum, ssq = _run_mlp_last_layer(
                h, w_bf16, scale, shift,
                m_tile=m_tile, m_real=m_real, m_pad=m_pad, nsample=nsample)
        else:
            h, ssum, ssq = _run_mlp_inner_layer(
                h, w_bf16, scale, shift,
                m_tile=m_tile, m_real=m_real, m_pad=m_pad)

        # Tiny XLA finalization of the single-pass stats -> folded BN affine.
        # TODO(synk): single-pass E[x^2]-mean^2 in f32 can cancel badly when
        # |mean| >> std; switch to pairwise/Welford accumulation if that bites.
        total = jnp.sum(ssum, axis=0)[:, 0]
        total_sq = jnp.sum(ssq, axis=0)[:, 0]
        mean = total / R
        var = jnp.maximum(total_sq / R - mean * mean, 0.0)   # biased (train-mode) var
        inv_std = jax.lax.rsqrt(var + eps)
        s = gamma * inv_std
        b = beta - mean * s

        if is_last:
            # max_K relu(s*y + b) == relu(s*max_K y + b) when s >= 0,
            #                        relu(s*min_K y + b) when s <  0.
            y_sel = jnp.where((s >= 0.0)[:, None], ymax, ymin)       # (C, M_pad)
            out = jnp.maximum(y_sel * s[:, None] + b[:, None], 0.0)
            return out[:, :m_real]                                   # drop lane padding

        scale = s[:, None].astype(jnp.float32)   # (C_out, 1) folded affine for next layer
        shift = b[:, None].astype(jnp.float32)


# ----------------------------------------------------------------------------
# Plain-JAX glue: FPS, ball query, gather (data-dependent indexing / sorting)
# ----------------------------------------------------------------------------
def square_distance(src, dst):
    d = -2.0 * jnp.einsum("bnc,bmc->bnm", src, dst)
    d = d + jnp.sum(src ** 2, -1)[:, :, None]
    d = d + jnp.sum(dst ** 2, -1)[:, None, :]
    return d


def index_points(points, idx):
    B = points.shape[0]
    idx_flat = idx.reshape(B, -1)
    out = jnp.take_along_axis(points, idx_flat[..., None], axis=1)
    return out.reshape(idx.shape + (points.shape[-1],))


def farthest_point_sample(xyz, npoint, key):
    B, N, _ = xyz.shape
    farthest = jax.random.randint(key, (B,), 0, N, dtype=jnp.int32)
    distance = jnp.full((B, N), 1e10, dtype=jnp.float32)
    centroids = jnp.zeros((B, npoint), dtype=jnp.int32)

    def body(i, carry):
        centroids, distance, farthest = carry
        centroids = centroids.at[:, i].set(farthest)
        centroid = jnp.take_along_axis(xyz, farthest[:, None, None], axis=1)
        dist = jnp.sum((xyz - centroid) ** 2, -1)
        distance = jnp.minimum(distance, dist)
        farthest = jnp.argmax(distance, -1).astype(jnp.int32)
        return centroids, distance, farthest

    centroids, _, _ = jax.lax.fori_loop(0, npoint, body,
                                        (centroids, distance, farthest))
    return centroids


def query_ball_point(radius, nsample, xyz, new_xyz):
    B, N, _ = xyz.shape
    S = new_xyz.shape[1]
    sqrdists = square_distance(new_xyz, xyz)
    group_idx = jnp.broadcast_to(jnp.arange(N, dtype=jnp.int32), (B, S, N))
    group_idx = jnp.where(sqrdists > radius ** 2, jnp.int32(N), group_idx)
    group_idx = jnp.sort(group_idx, axis=-1)[:, :, :nsample]
    group_first = jnp.broadcast_to(group_idx[:, :, :1], group_idx.shape)
    group_idx = jnp.where(group_idx == N, group_first, group_idx)
    return group_idx


# ----------------------------------------------------------------------------
# Module forward
# ----------------------------------------------------------------------------
def pointnet_sa_msg_forward(xyz, points, params, npoint, radius_list,
                            nsample_list, fps_key):
    """
    xyz:    (B, 3, N)  positions
    points: (B, D, N)  features (or None)
    returns new_xyz (B, 3, S), new_points_concat (B, sum(last mlp channels), S)
    """
    xyz_t = jnp.transpose(xyz, (0, 2, 1))                            # (B,N,3)
    points_t = jnp.transpose(points, (0, 2, 1)) if points is not None else None
    B, N, _ = xyz_t.shape
    S = npoint
    m_real = B * S
    m_pad = ((m_real + 127) // 128) * 128     # lane axis padded to 128 multiple

    # TODO(synk): torch.randint seed stream differs; a JAX PRNG picks the FPS start index.
    fps_idx = farthest_point_sample(xyz_t, S, fps_key)
    new_xyz = index_points(xyz_t, fps_idx)                           # (B,S,3)

    # TODO(synk): the two radius scales could still be fused into one pallas_call
    # per layer (block-diagonal weights / leading scale grid axis) to shave launch
    # and stat-finalization glue; modest win, skipped for clarity.
    new_points_list = []
    for i, radius in enumerate(radius_list):
        K = nsample_list[i]
        group_idx = query_ball_point(radius, K, xyz_t, new_xyz)      # (B,S,K)
        grouped_xyz = index_points(xyz_t, group_idx) - new_xyz[:, :, None, :]
        if points_t is not None:
            grouped_pts = index_points(points_t, group_idx)          # (B,S,K,D)
            grouped_pts = jnp.concatenate([grouped_pts, grouped_xyz], axis=-1)
        else:
            grouped_pts = grouped_xyz                                # (B,S,K,Cin)

        c_in = grouped_pts.shape[-1]
        # Cast to bf16 BEFORE the big layout copy so it moves half the bytes.
        # TODO(synk): gathering directly into channels-first layout would remove
        # this transpose copy entirely.
        grouped_pts = grouped_pts.astype(jnp.bfloat16)
        # channels-first, K folded onto the lane axis: (C_in, K, B*S) -> pad -> (C_in, K*M_pad)
        x = jnp.transpose(grouped_pts, (3, 2, 0, 1)).reshape(c_in, K, m_real)
        if m_pad > m_real:
            x = jnp.pad(x, ((0, 0), (0, 0), (0, m_pad - m_real)))
        x = x.reshape(c_in, K * m_pad)

        out = run_scale_mlp(x, params[i], m_real, m_pad, K)          # (Cout, B*S)
        out = jnp.transpose(out.reshape(-1, B, S), (1, 0, 2))        # (B, Cout, S)
        new_points_list.append(out)

    new_xyz_out = jnp.transpose(new_xyz, (0, 2, 1))                  # (B,3,S)
    new_points_concat = jnp.concatenate(new_points_list, axis=1)
    return new_xyz_out, new_points_concat


# ----------------------------------------------------------------------------
# Deterministic parameter init (Conv2d 1x1 weight+bias, BN gamma/beta)
# ----------------------------------------------------------------------------
def init_params(key, in_channel, mlp_list):
    params = []
    for mlp in mlp_list:
        layers = []
        last = in_channel + 3
        for out_c in mlp:
            key, k1, k2, k3 = jax.random.split(key, 4)
            W = 0.1 * jax.random.normal(k1, (out_c, last), jnp.float32)   # (C_out, C_in)
            b = 0.05 * jax.random.normal(k2, (out_c,), jnp.float32)       # cancelled by BN
            gamma = 1.0 + 0.1 * jax.random.normal(k3, (out_c,), jnp.float32)
            beta = jnp.zeros((out_c,), jnp.float32)
            layers.append((W, b, gamma, beta))
            last = out_c
        params.append(layers)
    return params


if __name__ == "__main__":
    key = jax.random.PRNGKey(0)
    kx, kp, kf, kw = jax.random.split(key, 4)

    B, N, D = 2, 32, 4          # batch, num points, feature channels
    npoint = 8
    radius_list = [0.4, 0.8]
    nsample_list = [8, 16]
    mlp_list = [[16, 32], [16, 32]]

    xyz = jax.random.uniform(kx, (B, 3, N), jnp.float32)      # positions in [0,1)^3
    points = jax.random.normal(kp, (B, D, N), jnp.float32)    # features
    params = init_params(kw, D, mlp_list)

    new_xyz, new_points = pointnet_sa_msg_forward(
        xyz, points, params, npoint, radius_list, nsample_list, kf)
    jax.block_until_ready((new_xyz, new_points))

    assert new_xyz.shape == (B, 3, npoint)
    assert new_points.shape == (B, sum(m[-1] for m in mlp_list), npoint)
    assert bool(jnp.all(jnp.isfinite(new_points)))
    print("KERNEL_OK")
</pallas_src>

<mosaic_0001>
module attributes {stable_mosaic.version = 11 : i64} {
  func.func @_mlp_layer_kernel(%arg0: i32, %arg1: i32, %arg2: memref<7x128xbf16, #tpu.memory_space<vmem>>, %arg3: memref<16x7xbf16, #tpu.memory_space<vmem>>, %arg4: memref<16x128xbf16, #tpu.memory_space<vmem>>, %arg5: memref<1x16x1xf32, #tpu.memory_space<vmem>>, %arg6: memref<1x16x1xf32, #tpu.memory_space<vmem>>) attributes {dimension_semantics = [#tpu.dimension_semantics<parallel>, #tpu.dimension_semantics<arbitrary>], iteration_bounds = array<i64: 2, 4>, scalar_prefetch = 0 : i64, scratch_operands = 0 : i64, tpu.core_type = #tpu.core_type<tc>, window_params = [{transform_indices = @transform_0, window_bounds = array<i64: 7, 128>}, {pipeline_mode = #tpu.pipeline_mode<synchronous>, transform_indices = @transform_1, window_bounds = array<i64: 16, 7>}, {transform_indices = @transform_2, window_bounds = array<i64: 16, 128>}, {transform_indices = @transform_3, window_bounds = array<i64: 1, 16, 1>}, {transform_indices = @transform_4, window_bounds = array<i64: 1, 16, 1>}]} {
    %c0 = arith.constant 0 : index
    %c0_0 = arith.constant 0 : index
    %0 = vector.load %arg2[%c0, %c0_0] : memref<7x128xbf16, #tpu.memory_space<vmem>>, vector<7x128xbf16>
    %c0_1 = arith.constant 0 : index
    %c0_2 = arith.constant 0 : index
    %1 = vector.load %arg3[%c0_1, %c0_2] : memref<16x7xbf16, #tpu.memory_space<vmem>>, vector<16x7xbf16>
    %cst = arith.constant dense<0.000000e+00> : vector<16x128xf32>
    %2 = tpu.matmul %1, %0, %cst {dimension_numbers = #tpu.dot_dimension_numbers<[1], [0], [0], [1], [0, 0, 1, 1], [], []>} : vector<16x7xbf16>, vector<7x128xbf16>, vector<16x128xf32> -> vector<16x128xf32>
    %c0_i32 = arith.constant 0 : i32
    %3 = arith.cmpi eq, %arg1, %c0_i32 : i32
    %4 = arith.extui %3 : i1 to i32
    %c0_i32_3 = arith.constant 0 : i32
    %5 = arith.cmpi ne, %4, %c0_i32_3 : i32
    scf.if %5 {
      %cst_20 = arith.constant 0.000000e+00 : f32
      %25 = vector.broadcast %cst_20 : f32 to vector<1x16x1xf32>
      %c0_21 = arith.constant 0 : index
      %c0_22 = arith.constant 0 : index
      %c0_23 = arith.constant 0 : index
      %26 = vector.load %arg5[%c0_21, %c0_22, %c0_23] : memref<1x16x1xf32, #tpu.memory_space<vmem>>, vector<1x16x1xf32>
      tpu.vector_store %arg5[%c0_21, %c0_22, %c0_23], %25 {strides = array<i32>} : memref<1x16x1xf32, #tpu.memory_space<vmem>>, vector<1x16x1xf32>,
      %cst_24 = arith.constant 0.000000e+00 : f32
      %27 = vector.broadcast %cst_24 : f32 to vector<1x16x1xf32>
      %c0_25 = arith.constant 0 : index
      %c0_26 = arith.constant 0 : index
      %c0_27 = arith.constant 0 : index
      %28 = vector.load %arg6[%c0_25, %c0_26, %c0_27] : memref<1x16x1xf32, #tpu.memory_space<vmem>>, vector<1x16x1xf32>
      tpu.vector_store %arg6[%c0_25, %c0_26, %c0_27], %27 {strides = array<i32>} : memref<1x16x1xf32, #tpu.memory_space<vmem>>, vector<1x16x1xf32>,
    } else {
    }
    %c0_4 = arith.constant 0 : index
    %c0_5 = arith.constant 0 : index
    %c0_6 = arith.constant 0 : index
    %6 = vector.load %arg5[%c0_4, %c0_5, %c0_6] : memref<1x16x1xf32, #tpu.memory_space<vmem>>, vector<1x16x1xf32>
    %7 = vector.shape_cast %6 : vector<1x16x1xf32> to vector<16x1xf32>
    %cst_7 = arith.constant dense<0.000000e+00> : vector<16xf32>
    %8 = vector.multi_reduction <add>, %2, %cst_7 [1] : vector<16x128xf32> to vector<16xf32>
    %9 = vector.shape_cast %8 : vector<16xf32> to vector<16x1xf32>
    %10 = arith.addf %7, %9 : vector<16x1xf32>
    %c0_8 = arith.constant 0 : index
    %c0_9 = arith.constant 0 : index
    %c0_10 = arith.constant 0 : index
    %11 = vector.load %arg5[%c0_8, %c0_9, %c0_10] : memref<1x16x1xf32, #tpu.memory_space<vmem>>, vector<1x16x1xf32>
    %12 = vector.shape_cast %11 : vector<1x16x1xf32> to vector<16x1xf32>
    %13 = vector.shape_cast %10 : vector<16x1xf32> to vector<1x16x1xf32>
    tpu.vector_store %arg5[%c0_8, %c0_9, %c0_10], %13 {strides = array<i32>} : memref<1x16x1xf32, #tpu.memory_space<vmem>>, vector<1x16x1xf32>,
    %c0_11 = arith.constant 0 : index
    %c0_12 = arith.constant 0 : index
    %c0_13 = arith.constant 0 : index
    %14 = vector.load %arg6[%c0_11, %c0_12, %c0_13] : memref<1x16x1xf32, #tpu.memory_space<vmem>>, vector<1x16x1xf32>
    %15 = vector.shape_cast %14 : vector<1x16x1xf32> to vector<16x1xf32>
    %16 = arith.mulf %2, %2 : vector<16x128xf32>
    %cst_14 = arith.constant dense<0.000000e+00> : vector<16xf32>
    %17 = vector.multi_reduction <add>, %16, %cst_14 [1] : vector<16x128xf32> to vector<16xf32>
    %18 = vector.shape_cast %17 : vector<16xf32> to vector<16x1xf32>
    %19 = arith.addf %15, %18 : vector<16x1xf32>
    %c0_15 = arith.constant 0 : index
    %c0_16 = arith.constant 0 : index
    %c0_17 = arith.constant 0 : index
    %20 = vector.load %arg6[%c0_15, %c0_16, %c0_17] : memref<1x16x1xf32, #tpu.memory_space<vmem>>, vector<1x16x1xf32>
    %21 = vector.shape_cast %20 : vector<1x16x1xf32> to vector<16x1xf32>
    %22 = vector.shape_cast %19 : vector<16x1xf32> to vector<1x16x1xf32>
    tpu.vector_store %arg6[%c0_15, %c0_16, %c0_17], %22 {strides = array<i32>} : memref<1x16x1xf32, #tpu.memory_space<vmem>>, vector<1x16x1xf32>,
    %23 = arith.truncf %2 : vector<16x128xf32> to vector<16x128xbf16>
    %c0_18 = arith.constant 0 : index
    %c0_19 = arith.constant 0 : index
    %24 = vector.load %arg4[%c0_18, %c0_19] : memref<16x128xbf16, #tpu.memory_space<vmem>>, vector<16x128xbf16>
    tpu.vector_store %arg4[%c0_18, %c0_19], %23 {strides = array<i32>} : memref<16x128xbf16, #tpu.memory_space<vmem>>, vector<16x128xbf16>,
    return
  }
  func.func @transform_0(%arg0: i32, %arg1: i32) -> (i32, i32) {
    %c4_i32 = arith.constant 4 : i32
    %0 = arith.muli %arg0, %c4_i32 : i32
    %1 = arith.addi %0, %arg1 : i32
    %c0_i32 = arith.constant 0 : i32
    %c0_i32_0 = arith.constant 0 : i32
    return %c0_i32, %1 : i32, i32
  }
  func.func @transform_1(%arg0: i32, %arg1: i32) -> (i32, i32) {
    %c0_i32 = arith.constant 0 : i32
    %c0_i32_0 = arith.constant 0 : i32
    %c0_i32_1 = arith.constant 0 : i32
    return %c0_i32, %c0_i32_0 : i32, i32
  }
  func.func @transform_2(%arg0: i32, %arg1: i32) -> (i32, i32) {
    %c4_i32 = arith.constant 4 : i32
    %0 = arith.muli %arg0, %c4_i32 : i32
    %1 = arith.addi %0, %arg1 : i32
    %c0_i32 = arith.constant 0 : i32
    %c0_i32_0 = arith.constant 0 : i32
    return %c0_i32, %1 : i32, i32
  }
  func.func @transform_3(%arg0: i32, %arg1: i32) -> (i32, i32, i32) {
    %c0_i32 = arith.constant 0 : i32
    %c0_i32_0 = arith.constant 0 : i32
    %c0_i32_1 = arith.constant 0 : i32
    return %arg0, %c0_i32, %c0_i32_0 : i32, i32, i32
  }
  func.func @transform_4(%arg0: i32, %arg1: i32) -> (i32, i32, i32) {
    %c0_i32 = arith.constant 0 : i32
    %c0_i32_0 = arith.constant 0 : i32
    %c0_i32_1 = arith.constant 0 : i32
    return %arg0, %c0_i32, %c0_i32_0 : i32, i32, i32
  }
}

</mosaic_0001>

<bundles_post_ra>
// kernel: tpu_custom_call.1
= control target key start
LH: loop header
LB: loop body
LE: loop exit
PB: predicated region body
PF: predicated region fallthrough
CT: control target
= control target key end

     0   :  { %10 = vsyncpa [#allocation3], 0  ;;  %s1054_s0 = inlined_call_operand.hbm [shape: bf16[7,1024], index: 0, kind: input, shape index: {}]   ;;  %s1055_s1 = inlined_call_operand.vmem [shape: bf16[16,7], index: 1, kind: input, shape index: {}]   ;;  %s1056_s2 = inlined_call_operand.hbm [shape: bf16[16,1024], index: 2, kind: output, shape index: {0}]   ;;  %s1057_s3 = inlined_call_operand.vmem [shape: f32[2,16,1], index: 3, kind: output, shape index: {1}]   ;;  %s1058_s4 = inlined_call_operand.vmem [shape: f32[2,16,1], index: 4, kind: output, shape index: {2}]  }
   0x1   :  { %12 = vsyncpa [#allocation3 + $0x1], 0 }
   0x2   :  { %13 = vsyncpa [#allocation4], 0 }
   0x3   :  { %15 = vsyncpa [#allocation4 + $0x1], 0  ;;  %s831_s15 = smov 0   ;;  %s833_s16 = smov 0  }
   0x4   :  { %s835_s17 = smov 0   ;;  %s837_s18 = smov 0  }
   0x5   :  { %s839_s19 = smov 0   ;;  %s841_s20 = smov 0  }
   0x6   :  { %s843_s21 = smov 0   ;;  %s845_s22 = smov 0  }
   0x7 LB: > { %s536_s23 = sadd.s32 4294967295, %s795_s22   ;;  %s537_s24 = sadd.s32 4294967294, %s795_s22   ;;  %s795_s22 = sphi %s845_s22, %s21_s22   ;;  %s791_s21 = sphi %s843_s21, %s1075_s21   ;;  %s787_s20 = sphi %s841_s20, %s1074_s20   ;;  %s783_s19 = sphi %s839_s19, %s1073_s19   ;;  %s779_s18 = sphi %s837_s18, %s1072_s18   ;;  %s775_s17 = sphi %s835_s17, %s1071_s17   ;;  %s771_s16 = sphi %s833_s16, %s1070_s16   ;;  %s767_s15 = sphi %s831_s15, %s1069_s15  }
   0x8   : > { %s30_s25 = sadd.s32 1, %s787_s20  ;;  %s33_s26 = sadd.s32 1, %s791_s21 }
   0x9   : > { %p31_p0 = scmp.ge.s32.totalorder %s30_s25, 4  ;;  %s538_s27 = sshll.u32 %s791_s21, 2 }
   0xa   : > { %s38_s28 = sadd.s32 %s787_s20, %s538_s27  ;;  %s44_s29 = sadd.s32 1, %s775_s17 }
   0xb   : > { %s1077_s25 = smov (%p31_p0, %s30_s25), 0  ;;  %s1079_s26 = smov (!%p31_p0, %s33_s26), %s791_s21 }
   0xc   : > { %p51_p1 = scmp.ne.s32.totalorder %s775_s17, %s771_s16  ;;  %p52_p2 = scmp.eq.s32.totalorder %s795_s22, 0 }
   0xd   : > { %p35_p3 = scmp.ge.s32.totalorder %s1079_s26, 2  ;;  %p57_p4 = scmp.ne.s32.totalorder %s771_s16, %s767_s15 }
   0xe   : > { %p886_p5 = por %p52_p2, %p51_p1  ;;  %p58_p6 = scmp.eq.s32.totalorder %s536_s23, 0 }
   0xf   : > { %s1081_s26 = smov (%p35_p3, %s1079_s26), 0  ;;  %p106_p8 = scmp.eq.s32.totalorder %s536_s23, 7 }
  0x10   : > { %p892_p7 = por %p58_p6, %p57_p4  ;;  %s539_s6 = sshll.u32 %s1081_s26, 2 }
  0x11   : > { %p112_p9 = scmp.eq.s32.totalorder %s537_s24, 7  ;;  %s40_s7 = sadd.s32 %s539_s6, %s1077_s25 }
  0x12   : > { %p898_p10 = por %p106_p8, %p51_p1  ;;  %s41_s9 = ssub.s32 %s38_s28, %s40_s7 }
  0x13   : > { %p902_p11 = por %p112_p9, %p57_p4  ;;  %p42_p12 = scmp.eq.s32.totalorder %s41_s9, 0 }
  0x14   : > { %s1062_s8 = scalar_select %p898_p10, 1, 0 }
  0x15   : > { %s1063_s10 = scalar_select %p902_p11, 1, 0 }
  0x16   : > { %p593_p13 = scmp.lt.s32.totalorder %s795_s22, 8  ;;  %s187_s11 = sand.u32 1, %s775_s17  }
  0x17   : > { %s909_s12 = scalar_select %p42_p12, %s775_s17, %s44_s29  }
  0x18   : > { %s544_s13 = sshll.u32 %s187_s11, 2  ;;  %s546_s14 = sshll.u32 %s38_s28, 6 }
  0x19   : > { %s914_s27 = scalar_lea.hbm %s1054_s0, %s546_s14  ;;  %s191_s6 = scalar_lea.vmem [#allocation2], %s544_s13 }
  0x1a   : > { %s200_s7 = sshll.u32 %s191_s6, 4  ;;  %p920_p0 = pnand %p593_p13, %p886_p5  ;;  %s916_s7 = int_to_ptr.vmem [resolvable:$true] %s200_s7 }
  0x1b   : > { %s188_s28 = scalar_lea.sflag [#allocation3], %s187_s11  ;;  %s667_s29 = scalar_lea.hbm %s914_s27, 64 }
  0x1c   : > { %p668_p3 = scmp.ne.s32.totalorder %s914_s27, %s667_s29  ;;  %p669_p4 = pneg %p920_p0 }
  0x1d   : > { %s672_s30 = scalar_lea.hbm %s1054_s0, 512  ;;  %p673_p5 = scmp.lt.u32.totalorder %s914_s27, %s1054_s0 }
  0x1e   : > { %p670_p6 = pnand %p669_p4, %p668_p3  ;;  %p674_p9 = scmp.lt.u32.totalorder %s672_s30, %s667_s29 }
  0x1f   : > { %p676_p13 = scmp.lt.u32.totalorder %s667_s29, %s914_s27 }
  0x20   : > { %p671_p8 = pneg %p670_p6  ;;  %p675_p12 = por %p674_p9, %p673_p5 }
  0x22   : > { %p677_p1 = por %p676_p13, %p675_p12 }
  0x24   : > { %p678_p2 = pnand %p677_p1, %p671_p8 }
  0x26   : > { %681 = shalt.err (!%p678_p2)
}
  0x27   : > { %s682_s11 = scalar_lea.vmem %s916_s7, 64  ;;  %s797_s6 = smov [#allocation2]  }
  0x28   : > { %p683_p3 = scmp.ne.s32.totalorder %s916_s7, %s682_s11  ;;  %s687_s13 = sshll.u32 %s797_s6, 4  ;;  %s688_s13 = int_to_ptr.vmem [resolvable:$false] %s687_s13 }
  0x29   : > { %s689_s14 = scalar_lea.vmem %s688_s13, 128  ;;  %p690_p10 = scmp.lt.s32.totalorder %s916_s7, %s688_s13 }
  0x2a   : > { %p685_p6 = pnand %p683_p3, %p669_p4  ;;  %p691_p5 = scmp.lt.s32.totalorder %s689_s14, %s682_s11 }
  0x2c   : > { %p686_p11 = pneg %p685_p6  ;;  %p692_p9 = por %p691_p5, %p690_p10 }
  0x2e   : > { %p693_p12 = pnand %p692_p9, %p686_p11 }
  0x30   : > { %696 = shalt.err (!%p693_p12)
}
  0x31   : > { %588 = dma.hbm_to_vmem [thread:$0]  (!%p920_p0), %s914_s27, 64, %s916_s7, %s188_s28  }
  0x32   : > { %p1065_p1 = scmp.lt.s32.totalorder %s795_s22, 9  ;;  %p1066_p2 = scmp.ge.s32.totalorder %s795_s22, 1 }
  0x34   : > { %p206_p4 = pnand %p1066_p2, %p1065_p1 }
  0x35   : > { %s956_s29 = sand.u32 (!%p206_p4), 1, %s771_s16  }
  0x36   : > { %209 = sbr.rel (%p206_p4) target bundleno = 437 (0x1b5), region = 28  ;;  %s548_s30 = sshll.u32 (!%p206_p4), %s956_s29, 2 }
  0x37   : > { %s212_s23 = scalar_lea.sflag (!%p206_p4), [#allocation3], %s956_s29  ;;  %s215_s24 = scalar_lea.vmem (!%p206_p4), [#allocation2], %s548_s30 }
  0x3d   : > { %758 = dma.done.wait (%p892_p7), %s212_s23, 64  }
  0x3e   : > { %760 = vsyncadd (%p892_p7), %s212_s23, 4294967232  ;;  %s549_s27 = sshll.u32 %s956_s29, 3  ;;  %p254_p10 = scmp.lt.s32.totalorder %s783_s19, 1  ;;  %vm277_vm0 = vcmask 1042432   ;;  %v798_v0 = vmov 0.0   ;;  %vm278_vm1 = vcmask 1043456  }
  0x3f   : > { %575 = vmatprep.subr.bf16.mxu0 %v798_v0  ;;  %v799_v1 = vmov 65535   ;;  %vm800_vm2 = vmmov 0   ;;  %v265_v4 = vld [vmem:[%s215_s24] sm:$0xf]  ;;  %vm273_vm3 = vcmask 56320   ;;  %p556_p7 = scmp.ne.s32.totalorder %s779_s18, 0 }
  0x40   : > { %s255_s7 = scalar_select %p254_p10, %s783_s19, 1  ;;  %v279_v2 = vsel %vm277_vm0, 4294967295, %v799_v1  ;;  %577 = vmatprep.mubr.msk.bf16.mxu0 %vm800_vm2, %v798_v0  ;;  %v666_v6 = vld [vmem:[%s1055_s1] sm:$0xff]  }
  0x41   : > { %v280_v3 = vsel %vm278_vm1, %v279_v2, 0  ;;  %vm329_vm4 = vcmask (!%p556_p7), 7168   ;;  %v801_v11 = vmov (!%p556_p7), 0.0  }
  0x42   : > { %s564_s9 = sshll.u32 %s255_s7, 4  ;;  %v282_v5 = vand.u32 %v280_v3, %v265_v4  ;;  %s235_s7 = scalar_lea.vmem [#allocation5], %s549_s27 }
  0x43   : > { %s970_s5 = scalar_lea.vmem %s1057_s3, %s564_s9  ;;  %s975_s14 = scalar_lea.vmem %s1058_s4, %s564_s9 }
  0x44   : > { %576 = vmatpush3.bf16.msra.mxu0 %v282_v5  ;;  %330 = vst.msk [vmem:[%s970_s5] sm:$0xff] (!%p556_p7), %vm329_vm4, %v801_v11  ;;  %331 = vst.msk [vmem:[%s970_s5 + $0x8] sm:$0xff] (!%p556_p7), %vm329_vm4, %v801_v11 }
  0x45   : > { %332 = vst.msk [vmem:[%s975_s14] sm:$0xff] (!%p556_p7), %vm329_vm4, %v801_v11  ;;  %333 = vst.msk [vmem:[%s975_s14 + $0x8] sm:$0xff] (!%p556_p7), %vm329_vm4, %v801_v11 }
  0x47   : > { %578 = vmatmul.mubr.msk.bf16.vlgmr.msra.gmra.mrb[0].mxu0 %vm273_vm3, %v666_v6 }
 0x117   : > { %328 = sbr.rel (%p556_p7) target bundleno = 286 (0x11e), region = 36 }
 0x11a   : > { %v318_v7 = vpop.f32.mrb[0].mxu0 }
 0x11b   : > { %v579_v8 = vpop.f32.mrb[1].mxu0 }
 0x11c   : > { %v321_v9 = vpop.f32.mrb[2].mxu0 }
 0x11d   : > { %v580_v10 = vpop.f32.mrb[3].mxu0 }
 0x11e PF: > { %336 = vadd.xlane.f32.xlu0 %v318_v7  ;;  %v347_v12 = vmul.f32 %v318_v7, %v318_v7  ;;  %v348_v13 = vmul.f32 %v321_v9, %v321_v9  ;;  %s560_s24 = sshll.u32 %s783_s19, 2  ;;  %v571_v14 = vpack.c.bf16 %v321_v9, %v318_v7  ;;  %s392_s28 = sshll.u32 %s235_s7, 4  ;;  %s992_s28 = int_to_ptr.vmem [resolvable:$true] %s392_s28 }
 0x11f   : > { %s386_s27 = sadd.s32 %s779_s18, %s560_s24  ;;  %s368_s30 = scalar_lea.sflag [#allocation4], %s956_s29 }
 0x120   : > { %349 = vadd.xlane.f32.xlu1 %v347_v12  ;;  %s561_s9 = sshll.u32 %s386_s27, 6  ;;  %572 = vst [vmem:[%s235_s7] sm:$0xff] %v571_v14   ;;  %s697_s23 = scalar_lea.vmem %s992_s28, 128 }
 0x121   : > { %s990_s13 = scalar_lea.hbm %s1056_s2, %s561_s9  ;;  %p698_p11 = scmp.ne.s32.totalorder %s992_s28, %s697_s23 }
 0x122   : > { %338 = vadd.xlane.f32.xlu0 %v321_v9  ;;  %p1067_p0 = scmp.ne.s32.totalorder %s1062_s8, 0  ;;  %s802_s18 = smov [#allocation5]  }
 0x123   : > { %s701_s19 = sshll.u32 %s802_s18, 4  ;;  %s702_s19 = int_to_ptr.vmem [resolvable:$false] %s701_s19 }
 0x124   : > { %351 = vadd.xlane.f32.xlu1 %v348_v13  ;;  %p699_p8 = pnand %p698_p11, %p1067_p0  ;;  %s703_s7 = scalar_lea.vmem %s702_s19, 256 }
 0x125   : > { %p704_p3 = scmp.lt.s32.totalorder %s992_s28, %s702_s19  ;;  %p705_p6 = scmp.lt.s32.totalorder %s703_s7, %s697_s23 }
 0x126   : > { %p700_p13 = pneg %p699_p8 }
 0x127   : > { %p706_p5 = por %p705_p6, %p704_p3 }
 0x129   : > { %p707_p9 = pnand %p706_p5, %p700_p13 }
 0x12b   : > { %710 = shalt.err (!%p707_p9)
}
 0x12c   : > { %s711_s24 = scalar_lea.hbm %s990_s13, 128  ;;  %s715_s11 = scalar_lea.hbm %s1056_s2, 1024 }
 0x12d   : > { %p712_p12 = scmp.ne.s32.totalorder %s990_s13, %s711_s24  ;;  %p716_p4 = scmp.lt.u32.totalorder %s990_s13, %s1056_s2 }
 0x12e   : > { %p717_p10 = scmp.lt.u32.totalorder %s715_s11, %s711_s24  ;;  %p719_p11 = scmp.lt.u32.totalorder %s711_s24, %s990_s13 }
 0x12f   : > { %p713_p1 = pnand %p712_p12, %p1067_p0 }
 0x130   : > { %p718_p7 = por %p717_p10, %p716_p4 }
 0x131   : > { %p714_p2 = pneg %p713_p1 }
 0x132   : > { %p720_p8 = por %p719_p11, %p718_p7 }
 0x134   : > { %p721_p13 = pnand %p720_p8, %p714_p2 }
 0x136   : > { %724 = shalt.err (!%p721_p13)
}
 0x137   : > { %s803_s23 = smov 64   ;;  %s804_s19 = smov 512   ;;  %v334_v15 = vld [vmem:[%s970_s5] sm:$0xff]  ;;  %vm342_vm5 = vcmask 7168   ;;  %v335_v20 = vld [vmem:[%s970_s5 + $0x8] sm:$0xff] }
 0x138   : > { %s805_s7 = smov 4   ;;  %v345_v17 = vld [vmem:[%s975_s14] sm:$0xff]  ;;  %v346_v23 = vld [vmem:[%s975_s14 + $0x8] sm:$0xff] }
 0x139   : > { %583 = dma.vmem_to_hbm [thread:$0]  (%p1067_p0), %s992_s28, 128, %s990_s13, %s368_s30, %s803_s23, %s804_s19, %s805_s7  }
 0x1ab   : > { %v337_v16 = vpop.xlane.xlu0 %336 }
 0x1ac   : > { %v340_v18 = vadd.f32 %v337_v16, %v334_v15 }
 0x1ad   : > { %v350_v19 = vpop.xlane.xlu1 %349 }
 0x1ae   : > { %343 = vst.msk [vmem:[%s970_s5] sm:$0xff] %vm342_vm5, %v340_v18  ;;  %v353_v21 = vadd.f32 %v350_v19, %v345_v17 }
 0x1af   : > { %v339_v22 = vpop.xlane.xlu0 %338 }
 0x1b0   : > { %355 = vst.msk [vmem:[%s975_s14] sm:$0xff] %vm342_vm5, %v353_v21  ;;  %v341_v24 = vadd.f32 %v339_v22, %v335_v20 }
 0x1b1   : > { %v352_v25 = vpop.xlane.xlu1 %351 }
 0x1b2   : > { %344 = vst.msk [vmem:[%s970_s5 + $0x8] sm:$0xff] %vm342_vm5, %v341_v24  ;;  %v354_v26 = vadd.f32 %v352_v25, %v346_v23 }
 0x1b4   : > { %356 = vst.msk [vmem:[%s975_s14 + $0x8] sm:$0xff] %vm342_vm5, %v354_v26 }
 0x1b5 PF: > { %p594_p0 = scmp.ge.s32.totalorder %s795_s22, 2  ;;  %s413_s8 = sand.u32 1, %s767_s15  }
 0x1b6   : > { %p1068_p3 = scmp.ne.s32.totalorder %s1063_s10, 0  ;;  %s414_s29 = scalar_lea.sflag [#allocation4], %s413_s8 }
 0x1b8   : > { %p590_p6 = pnand %p594_p0, %p1068_p3 }
 0x1ba   : > { %762 = dma.done.wait (!%p590_p6), %s414_s29, 128  }
 0x1bb   : > { %764 = vsyncadd (!%p590_p6), %s414_s29, 4294967168  ;;  %s21_s22 = sadd.s32 1, %s795_s22   ;;  %s1069_s15 = smov %s771_s16 }
 0x1bc   : > { %p18_p5 = scmp.ge.s32.totalorder %s21_s22, 10   ;;  %s1070_s16 = smov %s775_s17 }
 0x1bd   : > { %s1071_s17 = smov %s909_s12  ;;  %s1072_s18 = smov %s787_s20 }
 0x1be   : > { %s1073_s19 = smov %s791_s21  ;;  %s1074_s20 = smov %s1077_s25 }
 0x1bf   : > { %s1075_s21 = smov %s1081_s26  ;;  %20 = sbr.rel (!%p18_p5) target bundleno = 7 (0x7), region = 101 }
 0x1c6   :  { %435 = vsyncpa [#allocation3], 1 }
 0x1c7   :  { %437 = vsyncpa [#allocation3 + $0x1], 1 }
 0x1c8   :  { %438 = vsyncpa [#allocation4], 1 }
 0x1c9   :  { %440 = vsyncpa [#allocation4 + $0x1], 1 }

</bundles_post_ra>
